<compile_context>
chip_gen: v7x
topology: tpu7x:2x2x1
jax: 0.10.0
libtpu: 0.0.40
codegen_flags: <defaults>
</compile_context>

<pallas_src>
import functools

import jax
import jax.numpy as jnp
from jax.experimental import pallas as pl
from jax.experimental.pallas import tpu as pltpu


_LANE = 128


# ---------------------------------------------------------------------------
# Helpers
# ---------------------------------------------------------------------------
def _round_up(a, m):
    return ((a + m - 1) // m) * m


def _pad2(a, rows, cols):
    pr, pc = rows - a.shape[0], cols - a.shape[1]
    if pr == 0 and pc == 0:
        return a
    return jnp.pad(a, ((0, pr), (0, pc)))


def _plan(n, tile, fused_max_n):
    """Pick (path, n_pad, tm, tk) for a given node count."""
    n128 = _round_up(n, _LANE)
    if n128 <= fused_max_n:
        # Fully-resident fused path: adj read from HBM once, no grid overhead.
        return "fused", n128, n128, n128
    tm = tk = min(tile, n128)
    n_pad = _round_up(n, tm)
    # Note: n_pad // tm >= 2 whenever fused_max_n >= 2*tile, so both v7x
    # TensorCores get row blocks on the "parallel" axis.
    return "grid", n_pad, tm, tk


def prepare_adjacency(adj, *, compute_dtype=jnp.bfloat16, tile=512,
                      fused_max_n=1024):
    """Pad + cast the adjacency once; reuse across forward calls."""
    _, n_pad, _, _ = _plan(adj.shape[0], tile, fused_max_n)
    return _pad2(adj, n_pad, n_pad).astype(compute_dtype)


# ---------------------------------------------------------------------------
# Kernels
# ---------------------------------------------------------------------------
def _gcn_fused_kernel(adj_ref, x_ref, w1_ref, b1_ref, w2_ref, b2_ref, out_ref):
    """Both layers fused; every operand VMEM-resident (small-N path)."""
    ax = jnp.dot(adj_ref[...], x_ref[...], preferred_element_type=jnp.float32)
    h = jnp.dot(ax, w1_ref[...], preferred_element_type=jnp.float32)
    h = jnp.maximum(h + b1_ref[...], 0.0)
    t = jnp.dot(h, w2_ref[...], preferred_element_type=jnp.float32)
    t = t.astype(adj_ref.dtype)                       # layer-2 MXU stream dtype
    out = jnp.dot(adj_ref[...], t, preferred_element_type=jnp.float32)
    out_ref[...] = out + b2_ref[...]


def _gcn_layer1_kernel(adj_ref, x_ref, w1_ref, b1_ref, w2_ref, t_ref, acc_ref,
                       *, tk):
    """t = relu((adj @ x) @ W1^T + b1) @ W2^T for one (tm, Fout_p) row block.

    x is fully VMEM-resident; the k-th (tk, Fin_p) chunk is sliced in-kernel.
    """
    k = pl.program_id(1)

    @pl.when(k == 0)
    def _init():
        acc_ref[...] = jnp.zeros_like(acc_ref)

    kk = pl.multiple_of(k * tk, tk)
    acc_ref[...] += jnp.dot(adj_ref[...], x_ref[pl.ds(kk, tk), :],
                            preferred_element_type=jnp.float32)

    @pl.when(k == pl.num_programs(1) - 1)
    def _finalize():
        # Tiny f32 matmuls, hidden under the adjacency DMA.
        h = jnp.dot(acc_ref[...], w1_ref[...], preferred_element_type=jnp.float32)
        h = jnp.maximum(h + b1_ref[...], 0.0)
        t = jnp.dot(h, w2_ref[...], preferred_element_type=jnp.float32)
        t_ref[...] = t.astype(t_ref.dtype)


def _gcn_layer2_kernel(adj_ref, t_ref, b2_ref, out_ref, acc_ref, *, tk):
    """out = adj @ t + b2 for one (tm, Fout_p) row block; t VMEM-resident."""
    k = pl.program_id(1)

    @pl.when(k == 0)
    def _init():
        acc_ref[...] = jnp.zeros_like(acc_ref)

    kk = pl.multiple_of(k * tk, tk)
    acc_ref[...] += jnp.dot(adj_ref[...], t_ref[pl.ds(kk, tk), :],
                            preferred_element_type=jnp.float32)

    @pl.when(k == pl.num_programs(1) - 1)
    def _finalize():
        out_ref[...] = (acc_ref[...] + b2_ref[...]).astype(out_ref.dtype)


# ---------------------------------------------------------------------------
# Wrapper
# ---------------------------------------------------------------------------
def gnn_forward(x, adj, w1, b1, w2, b2, *, adj_prepared=None,
                compute_dtype=jnp.bfloat16, tile=512, fused_max_n=1024):
    """GraphNeuralNetwork forward.

    x:  [N, Fin]       adj: [N, N]
    w1: [H, Fin]  b1: [H]          (nn.Linear layout)
    w2: [Fout, H] b2: [Fout]
    returns [N, Fout] float32.
    """
    N, f_in = x.shape
    hidden = w1.shape[0]
    f_out = w2.shape[0]

    path, n_pad, tm, tk = _plan(N, tile, fused_max_n)
    fin_p = _round_up(f_in, _LANE)
    h_p = _round_up(hidden, _LANE)
    fout_p = _round_up(f_out, _LANE)

    if adj_prepared is not None:
        assert adj_prepared.shape == (n_pad, n_pad), "adj_prepared shape mismatch"
        assert adj_prepared.dtype == compute_dtype, "adj_prepared dtype mismatch"
        adj_p = adj_prepared
    else:
        adj_p = _pad2(adj, n_pad, n_pad).astype(compute_dtype)

    # Features stream/reside in compute_dtype; small dense params stay f32.
    x_p = _pad2(x, n_pad, fin_p).astype(compute_dtype)
    w1t_p = _pad2(w1.T, fin_p, h_p).astype(jnp.float32)       # [Fin_p, H_p]
    b1_p = _pad2(b1.reshape(1, -1), 1, h_p).astype(jnp.float32)
    w2t_p = _pad2(w2.T, h_p, fout_p).astype(jnp.float32)      # [H_p, Fout_p]
    b2_p = _pad2(b2.reshape(1, -1), 1, fout_p).astype(jnp.float32)

    if path == "fused":
        vmem = pl.BlockSpec(memory_space=pltpu.MemorySpace.VMEM)
        out_p = pl.pallas_call(
            _gcn_fused_kernel,
            out_shape=jax.ShapeDtypeStruct((n_pad, fout_p), jnp.float32),
            in_specs=[vmem] * 6,
            out_specs=vmem,
        )(adj_p, x_p, w1t_p, b1_p, w2t_p, b2_p)
        return out_p[:N, :f_out]

    grid = (n_pad // tm, n_pad // tk)
    cparams = pltpu.CompilerParams(
        dimension_semantics=("parallel", "arbitrary"))

    # ---- Layer 1 (+ fold of W2): t = relu((adj @ x) @ W1^T + b1) @ W2^T ----
    t = pl.pallas_call(
        functools.partial(_gcn_layer1_kernel, tk=tk),
        out_shape=jax.ShapeDtypeStruct((n_pad, fout_p), compute_dtype),
        grid_spec=pltpu.PrefetchScalarGridSpec(
            num_scalar_prefetch=0,
            grid=grid,
            in_specs=[
                pl.BlockSpec((tm, tk), lambda i, k: (i, k)),        # adj (streamed)
                pl.BlockSpec((n_pad, fin_p), lambda i, k: (0, 0)),  # x    (resident)
                pl.BlockSpec((fin_p, h_p), lambda i, k: (0, 0)),    # W1^T (resident)
                pl.BlockSpec((1, h_p), lambda i, k: (0, 0)),        # b1   (resident)
                pl.BlockSpec((h_p, fout_p), lambda i, k: (0, 0)),   # W2^T (resident)
            ],
            out_specs=pl.BlockSpec((tm, fout_p), lambda i, k: (i, 0)),
            scratch_shapes=[pltpu.VMEM((tm, fin_p), jnp.float32)],
        ),
        compiler_params=cparams,
    )(adj_p, x_p, w1t_p, b1_p, w2t_p)

    # ---- Layer 2 (reassociated): out = adj @ t + b2 ----
    out_p = pl.pallas_call(
        functools.partial(_gcn_layer2_kernel, tk=tk),
        out_shape=jax.ShapeDtypeStruct((n_pad, fout_p), jnp.float32),
        grid_spec=pltpu.PrefetchScalarGridSpec(
            num_scalar_prefetch=0,
            grid=grid,
            in_specs=[
                pl.BlockSpec((tm, tk), lambda i, k: (i, k)),          # adj
                pl.BlockSpec((n_pad, fout_p), lambda i, k: (0, 0)),   # t  (resident)
                pl.BlockSpec((1, fout_p), lambda i, k: (0, 0)),       # b2 (resident)
            ],
            out_specs=pl.BlockSpec((tm, fout_p), lambda i, k: (i, 0)),
            scratch_shapes=[pltpu.VMEM((tm, fout_p), jnp.float32)],
        ),
        compiler_params=cparams,
    )(adj_p, t, b2_p)

    return out_p[:N, :f_out]


# ---------------------------------------------------------------------------
# References
# ---------------------------------------------------------------------------
def _dot(a, b):
    return jnp.dot(a, b, precision=jax.lax.Precision.HIGHEST)


def gnn_reference_f32(x, adj, w1, b1, w2, b2):
    """Exact f32 semantics of the PyTorch module."""
    h = jnp.maximum(_dot(_dot(adj, x), w1.T) + b1[None, :], 0.0)
    return _dot(_dot(adj, h), w2.T) + b2[None, :]


def gnn_reference_quantized(x, adj, w1, b1, w2, b2, dtype=jnp.bfloat16):
    """Mirrors the kernel's bf16-stream / f32-accumulate numeric path."""
    q = lambda a: a.astype(dtype).astype(jnp.float32)
    ax = _dot(q(adj), q(x))
    h = jnp.maximum(_dot(ax, w1.T) + b1[None, :], 0.0)   # finalize in f32
    t = _dot(h, w2.T)
    return _dot(q(adj), q(t)) + b2[None, :]


# ---------------------------------------------------------------------------
# Demo / self-check
# ---------------------------------------------------------------------------
def _make_inputs(key, n, f_in, hidden, f_out):
    kx, kadj, kw1, kb1, kw2, kb2 = jax.random.split(key, 6)
    x = jax.random.normal(kx, (n, f_in), dtype=jnp.float32)
    adj_raw = (jax.random.uniform(kadj, (n, n)) > 0.7).astype(jnp.float32)
    adj_raw = adj_raw + jnp.eye(n, dtype=jnp.float32)
    adj = adj_raw / jnp.sum(adj_raw, axis=1, keepdims=True)
    lim1 = 1.0 / float(f_in) ** 0.5
    lim2 = 1.0 / float(hidden) ** 0.5
    w1 = jax.random.uniform(kw1, (hidden, f_in), jnp.float32, -lim1, lim1)
    b1 = jax.random.uniform(kb1, (hidden,), jnp.float32, -lim1, lim1)
    w2 = jax.random.uniform(kw2, (f_out, hidden), jnp.float32, -lim2, lim2)
    b2 = jax.random.uniform(kb2, (f_out,), jnp.float32, -lim2, lim2)
    return x, adj, w1, b1, w2, b2


def _check(out, args):
    ref_q = gnn_reference_quantized(*args)
    ref_f = gnn_reference_f32(*args)
    assert jnp.allclose(out, ref_q, atol=1e-2, rtol=1e-2), \
        "mismatch vs quantized JAX reference"
    assert jnp.allclose(out, ref_f, atol=1e-1, rtol=1e-1), \
        "mismatch vs f32 JAX reference"


if __name__ == "__main__":
    key = jax.random.PRNGKey(0)
    k1, k2 = jax.random.split(key)

    # --- Small shapes consistent with the module (fused resident path) -----
    N, f_in, hidden, f_out = 16, 16, 32, 8
    args = _make_inputs(k1, N, f_in, hidden, f_out)
    x, adj, w1, b1, w2, b2 = args

    adj_cached = prepare_adjacency(adj)          # hoisted pad/cast, reusable
    out = gnn_forward(x, adj, w1, b1, w2, b2, adj_prepared=adj_cached)
    out = jax.block_until_ready(out)
    assert out.shape == (N, f_out)
    _check(out, args)

    # --- Exercise the tiled/pipelined large-N path on a modest size --------
    N2 = 256
    args2 = _make_inputs(k2, N2, f_in, hidden, f_out)
    out2 = gnn_forward(*args2, tile=128, fused_max_n=0)   # force gridded path
    out2 = jax.block_until_ready(out2)
    assert out2.shape == (N2, f_out)
    _check(out2, args2)

    print("KERNEL_OK")
</pallas_src>

<mosaic_0001>
module attributes {stable_mosaic.version = 11 : i64} {
  func.func @_gcn_fused_kernel(%arg0: memref<128x128xbf16, #tpu.memory_space<vmem>>, %arg1: memref<128x128xbf16, #tpu.memory_space<vmem>>, %arg2: memref<128x128xf32, #tpu.memory_space<vmem>>, %arg3: memref<1x128xf32, #tpu.memory_space<vmem>>, %arg4: memref<128x128xf32, #tpu.memory_space<vmem>>, %arg5: memref<1x128xf32, #tpu.memory_space<vmem>>, %arg6: memref<128x128xf32, #tpu.memory_space<vmem>>) attributes {dimension_semantics = [], scalar_prefetch = 0 : i64, scratch_operands = 0 : i64, tpu.core_type = #tpu.core_type<tc>} {
    %c0 = arith.constant 0 : index
    %c0_0 = arith.constant 0 : index
    %0 = vector.load %arg0[%c0, %c0_0] : memref<128x128xbf16, #tpu.memory_space<vmem>>, vector<128x128xbf16>
    %c0_1 = arith.constant 0 : index
    %c0_2 = arith.constant 0 : index
    %1 = vector.load %arg1[%c0_1, %c0_2] : memref<128x128xbf16, #tpu.memory_space<vmem>>, vector<128x128xbf16>
    %cst = arith.constant dense<0.000000e+00> : vector<128x128xf32>
    %2 = tpu.matmul %0, %1, %cst {dimension_numbers = #tpu.dot_dimension_numbers<[1], [0], [0], [1], [0, 0, 1, 1], [], []>} : vector<128x128xbf16>, vector<128x128xbf16>, vector<128x128xf32> -> vector<128x128xf32>
    %c0_3 = arith.constant 0 : index
    %c0_4 = arith.constant 0 : index
    %3 = vector.load %arg2[%c0_3, %c0_4] : memref<128x128xf32, #tpu.memory_space<vmem>>, vector<128x128xf32>
    %cst_5 = arith.constant dense<0.000000e+00> : vector<128x128xf32>
    %4 = tpu.matmul %2, %3, %cst_5 {dimension_numbers = #tpu.dot_dimension_numbers<[1], [0], [0], [1], [0, 0, 1, 1], [], []>} : vector<128x128xf32>, vector<128x128xf32>, vector<128x128xf32> -> vector<128x128xf32>
    %c0_6 = arith.constant 0 : index
    %c0_7 = arith.constant 0 : index
    %5 = vector.load %arg3[%c0_6, %c0_7] : memref<1x128xf32, #tpu.memory_space<vmem>>, vector<1x128xf32>
    %6 = vector.broadcast %5 : vector<1x128xf32> to vector<128x128xf32>
    %7 = arith.addf %4, %6 : vector<128x128xf32>
    %cst_8 = arith.constant 0.000000e+00 : f32
    %8 = vector.broadcast %cst_8 : f32 to vector<128x128xf32>
    %9 = arith.maximumf %7, %8 : vector<128x128xf32>
    %c0_9 = arith.constant 0 : index
    %c0_10 = arith.constant 0 : index
    %10 = vector.load %arg4[%c0_9, %c0_10] : memref<128x128xf32, #tpu.memory_space<vmem>>, vector<128x128xf32>
    %cst_11 = arith.constant dense<0.000000e+00> : vector<128x128xf32>
    %11 = tpu.matmul %9, %10, %cst_11 {dimension_numbers = #tpu.dot_dimension_numbers<[1], [0], [0], [1], [0, 0, 1, 1], [], []>} : vector<128x128xf32>, vector<128x128xf32>, vector<128x128xf32> -> vector<128x128xf32>
    %12 = arith.truncf %11 : vector<128x128xf32> to vector<128x128xbf16>
    %c0_12 = arith.constant 0 : index
    %c0_13 = arith.constant 0 : index
    %13 = vector.load %arg0[%c0_12, %c0_13] : memref<128x128xbf16, #tpu.memory_space<vmem>>, vector<128x128xbf16>
    %cst_14 = arith.constant dense<0.000000e+00> : vector<128x128xf32>
    %14 = tpu.matmul %13, %12, %cst_14 {dimension_numbers = #tpu.dot_dimension_numbers<[1], [0], [0], [1], [0, 0, 1, 1], [], []>} : vector<128x128xbf16>, vector<128x128xbf16>, vector<128x128xf32> -> vector<128x128xf32>
    %c0_15 = arith.constant 0 : index
    %c0_16 = arith.constant 0 : index
    %15 = vector.load %arg5[%c0_15, %c0_16] : memref<1x128xf32, #tpu.memory_space<vmem>>, vector<1x128xf32>
    %16 = vector.broadcast %15 : vector<1x128xf32> to vector<128x128xf32>
    %17 = arith.addf %14, %16 : vector<128x128xf32>
    %c0_17 = arith.constant 0 : index
    %c0_18 = arith.constant 0 : index
    %18 = vector.load %arg6[%c0_17, %c0_18] : memref<128x128xf32, #tpu.memory_space<vmem>>, vector<128x128xf32>
    tpu.vector_store %arg6[%c0_17, %c0_18], %17 {strides = array<i32>} : memref<128x128xf32, #tpu.memory_space<vmem>>, vector<128x128xf32>,
    return
  }
}

</mosaic_0001>

<bundles_post_ra>
// kernel: tpu_custom_call.1
= control target key start
LH: loop header
LB: loop body
LE: loop exit
PB: predicated region body
PF: predicated region fallthrough
CT: control target
= control target key end

     0   :  { %11 = vsyncpa [#allocation3], 0  ;;  %s1452_s0 = inlined_call_operand.hbm [shape: bf16[128,128], index: 0, kind: input, shape index: {}]   ;;  %s1453_s1 = inlined_call_operand.hbm [shape: bf16[128,128], index: 1, kind: input, shape index: {}]   ;;  %s1454_s2 = inlined_call_operand.hbm [shape: f32[128,128], index: 2, kind: input, shape index: {}]   ;;  %s1455_s3 = inlined_call_operand.vmem [shape: f32[1,128], index: 3, kind: input, shape index: {}]   ;;  %s1456_s4 = inlined_call_operand.hbm [shape: f32[128,128], index: 4, kind: input, shape index: {}]   ;;  %s1457_s5 = inlined_call_operand.vmem [shape: f32[1,128], index: 5, kind: input, shape index: {}]   ;;  %s1458_s6 = inlined_call_operand.hbm [shape: f32[128,128], index: 6, kind: output, shape index: {}]  }
   0x1   :  { %12 = vsyncpa [#allocation6], 0 }
   0x2   :  { %13 = vsyncpa [#allocation9], 0 }
   0x3   :  { %14 = vsyncpa [#allocation4], 0  ;;  %s1294_s21 = smov [#allocation5]   ;;  %s1295_s23 = smov [#allocation2]  }
   0x4   :  { %s32_s22 = sshll.u32 %s1294_s21, 4  ;;  %s20_s24 = sshll.u32 %s1295_s23, 4  ;;  %s33_s22 = int_to_ptr.vmem [resolvable:$true] %s32_s22  ;;  %s1338_s24 = int_to_ptr.vmem [resolvable:$true] %s20_s24 }
   0x5   :  { %s1176_s27 = scalar_lea.hbm %s1453_s1, 1024 }
   0x6   :  { %p1177_p0 = scmp.ne.s32.totalorder %s1453_s1, %s1176_s27  ;;  %p1180_p1 = scmp.lt.u32.totalorder %s1176_s27, %s1453_s1 }
   0x8   :  { %p1182_p2 = pnand %p1180_p1, %p1177_p0 }
   0xa   :  { %1185 = shalt.err (!%p1182_p2)
}
   0xb   :  { %s1186_s8 = scalar_lea.vmem %s33_s22, 1024  ;;  %p1191_p4 = scmp.lt.s32.totalorder %s33_s22, %s33_s22 }
   0xc   :  { %p1187_p3 = scmp.ne.s32.totalorder %s33_s22, %s1186_s8  ;;  %p1192_p5 = scmp.lt.s32.totalorder %s1186_s8, %s1186_s8 }
   0xe   :  { %p1193_p6 = por %p1192_p5, %p1191_p4 }
  0x10   :  { %p1194_p7 = pnand %p1193_p6, %p1187_p3 }
  0x12   :  { %1197 = shalt.err (!%p1194_p7)
}
  0x13   :  { %s1296_s9 = smov 64   ;;  %s1297_s10 = smov 4  }
  0x14   :  { %38 = dma.hbm_to_vmem [thread:$0]  %s1453_s1, 1024, %s33_s22, [#allocation6], %s1296_s9, %s1296_s9, %s1297_s10  }
  0x15   :  { %s1198_s15 = scalar_lea.hbm %s1452_s0, 1024 }
  0x16   :  { %p1199_p8 = scmp.ne.s32.totalorder %s1452_s0, %s1198_s15  ;;  %p1202_p9 = scmp.lt.u32.totalorder %s1198_s15, %s1452_s0 }
  0x18   :  { %p1204_p10 = pnand %p1202_p9, %p1199_p8 }
  0x1a   :  { %1207 = shalt.err (!%p1204_p10)
}
  0x1b   :  { %s1208_s20 = scalar_lea.vmem %s1338_s24, 1024  ;;  %p1213_p12 = scmp.lt.s32.totalorder %s1338_s24, %s1338_s24 }
  0x1c   :  { %p1209_p11 = scmp.ne.s32.totalorder %s1338_s24, %s1208_s20  ;;  %p1214_p13 = scmp.lt.s32.totalorder %s1208_s20, %s1208_s20 }
  0x1e   :  { %p1215_p0 = por %p1214_p13, %p1213_p12 }
  0x20   :  { %p1216_p1 = pnand %p1215_p0, %p1209_p11 }
  0x22   :  { %1219 = shalt.err (!%p1216_p1)
}
  0x23   :  { %26 = dma.hbm_to_vmem [thread:$0]  %s1452_s0, 1024, %s1338_s24, [#allocation3], %s1296_s9, %s1296_s9, %s1297_s10  }
  0x24   :  { %s1298_s22 = smov [#allocation7]   ;;  %s1220_s27 = scalar_lea.hbm %s1454_s2, 2048 }
  0x25   :  { %s44_s23 = sshll.u32 %s1298_s22, 4  ;;  %p1221_p2 = scmp.ne.s32.totalorder %s1454_s2, %s1220_s27  ;;  %s45_s23 = int_to_ptr.vmem [resolvable:$true] %s44_s23 }
  0x26   :  { %p1224_p3 = scmp.lt.u32.totalorder %s1220_s27, %s1454_s2 }
  0x28   :  { %p1226_p4 = pnand %p1224_p3, %p1221_p2 }
  0x2a   :  { %1229 = shalt.err (!%p1226_p4)
}
  0x2b   :  { %s1230_s8 = scalar_lea.vmem %s45_s23, 2048  ;;  %p1235_p6 = scmp.lt.s32.totalorder %s45_s23, %s45_s23 }
  0x2c   :  { %p1231_p5 = scmp.ne.s32.totalorder %s45_s23, %s1230_s8  ;;  %p1236_p7 = scmp.lt.s32.totalorder %s1230_s8, %s1230_s8 }
  0x2e   :  { %p1237_p8 = por %p1236_p7, %p1235_p6 }
  0x30   :  { %p1238_p9 = pnand %p1237_p8, %p1231_p5 }
  0x32   :  { %1241 = shalt.err (!%p1238_p9)
}
  0x33   :  { %s1299_s0 = smov 128   ;;  %s1300_s24 = smov 8  }
  0x34   :  { %50 = dma.hbm_to_vmem [thread:$0]  %s1454_s2, 2048, %s45_s23, [#allocation6], %s1299_s0, %s1299_s0, %s1300_s24  }
  0x35   :  { %s1301_s11 = smov [#allocation8]   ;;  %s1242_s15 = scalar_lea.hbm %s1456_s4, 2048 }
  0x36   :  { %s58_s12 = sshll.u32 %s1301_s11, 4  ;;  %p1243_p10 = scmp.ne.s32.totalorder %s1456_s4, %s1242_s15  ;;  %s59_s12 = int_to_ptr.vmem [resolvable:$true] %s58_s12 }
  0x37   :  { %p1246_p11 = scmp.lt.u32.totalorder %s1242_s15, %s1456_s4 }
  0x39   :  { %p1248_p12 = pnand %p1246_p11, %p1243_p10 }
  0x3b   :  { %1251 = shalt.err (!%p1248_p12)
}
  0x3c   :  { %s1252_s20 = scalar_lea.vmem %s59_s12, 2048  ;;  %p1257_p0 = scmp.lt.s32.totalorder %s59_s12, %s59_s12 }
  0x3d   :  { %p1253_p13 = scmp.ne.s32.totalorder %s59_s12, %s1252_s20  ;;  %p1258_p1 = scmp.lt.s32.totalorder %s1252_s20, %s1252_s20 }
  0x3f   :  { %p1259_p2 = por %p1258_p1, %p1257_p0 }
  0x41   :  { %p1260_p3 = pnand %p1259_p2, %p1253_p13 }
  0x43   :  { %1263 = shalt.err (!%p1260_p3)
}
  0x44   :  { %64 = dma.hbm_to_vmem [thread:$0]  %s1456_s4, 2048, %s59_s12, [#allocation9], %s1299_s0, %s1299_s0, %s1300_s24  }
  0x45   :  { %1286 = dma.done.wait [#allocation3], 1024  }
  0x46   :  { %1287 = vsyncadd [#allocation3], 4294966272 }
  0x47   :  { %1288 = dma.done.wait [#allocation6], 3072  }
  0x48   :  { %1289 = vsyncadd [#allocation6], 4294964224 }
  0x49   :  { %1290 = dma.done.wait [#allocation9], 2048  }
  0x4a   :  { %1291 = vsyncadd [#allocation9], 4294965248  ;;  %v1160_v0 = vld [vmem:[#allocation5] sm:$0xff]   ;;  %v1161_v1 = vld [vmem:[#allocation5 + $0x8] sm:$0xff]  }
  0x4b   :  { %911 = vmatprep.subr.bf16.mxu0 %v1160_v0  ;;  %v1162_v2 = vld [vmem:[#allocation5 + $0x10] sm:$0xff]   ;;  %v1163_v3 = vld [vmem:[#allocation5 + $0x18] sm:$0xff]   ;;  %v1399_v4 = vld [vmem:[#allocation2] sm:$0xff]  }
  0x4c   :  { %912 = vmatpush3.bf16.msra.mxu0 %v1160_v0  ;;  %927 = vmatprep.mubr.bf16.mxu0 %v1399_v4  ;;  %v1164_v5 = vld [vmem:[#allocation5 + $0x20] sm:$0xff]   ;;  %v1165_v6 = vld [vmem:[#allocation5 + $0x28] sm:$0xff]   ;;  %v307_v9 = vld [vmem:[#allocation7 + $0x10] sm:$0xff] }
  0x4d   :  { %913 = vmatprep.subr.bf16.mxu0 %v1161_v1  ;;  %v305_v7 = vld [vmem:[#allocation7] sm:$0xff]  ;;  %v306_v8 = vld [vmem:[#allocation7 + $0x8] sm:$0xff]  ;;  %v308_v11 = vld [vmem:[#allocation7 + $0x18] sm:$0xff] }
  0x4e   :  { %v1087_v10 = vpack.c.bf16 %v306_v8, %v305_v7  ;;  %v1091_v12 = vpack.c.bf16 %v308_v11, %v307_v9  ;;  %v309_v13 = vld [vmem:[#allocation7 + $0x20] sm:$0xff]  ;;  %v310_v14 = vld [vmem:[#allocation7 + $0x28] sm:$0xff]  ;;  %v1166_v15 = vld [vmem:[#allocation5 + $0x30] sm:$0xff]  }
  0x4f   :  { %v1095_v16 = vpack.c.bf16 %v310_v14, %v309_v13  ;;  %v311_v17 = vld [vmem:[#allocation7 + $0x30] sm:$0xff]  ;;  %v312_v18 = vld [vmem:[#allocation7 + $0x38] sm:$0xff]  ;;  %v313_v21 = vld [vmem:[#allocation7 + $0x40] sm:$0xff] }
  0x50   :  { %914 = vmatpush3.bf16.msra.mxu0 %v1161_v1  ;;  %1088 = vmatprep.subr.bf16.mxu1 %v1087_v10  ;;  %v1167_v19 = vld [vmem:[#allocation5 + $0x38] sm:$0xff]   ;;  %v1099_v20 = vpack.c.bf16 %v312_v18, %v311_v17  ;;  %v314_v22 = vld [vmem:[#allocation7 + $0x48] sm:$0xff]  ;;  %v315_v25 = vld [vmem:[#allocation7 + $0x50] sm:$0xff] }
  0x51   :  { %915 = vmatprep.subr.bf16.mxu0 %v1162_v2  ;;  %1090 = vmatpush3.bf16.msra.mxu1 %v1087_v10  ;;  %v1103_v23 = vpack.c.bf16 %v314_v22, %v313_v21  ;;  %v1402_v24 = vld [vmem:[#allocation2 + $0x8] sm:$0xff]   ;;  %v316_v26 = vld [vmem:[#allocation7 + $0x58] sm:$0xff]  ;;  %v1404_v27 = vld [vmem:[#allocation2 + $0x10] sm:$0xff]  }
  0x52   :  { %1092 = vmatprep.subr.bf16.mxu1 %v1091_v12  ;;  %v1107_v28 = vpack.c.bf16 %v316_v26, %v315_v25  ;;  %v317_v29 = vld [vmem:[#allocation7 + $0x60] sm:$0xff]  ;;  %v318_v30 = vld [vmem:[#allocation7 + $0x68] sm:$0xff]  ;;  %v1408_v32 = vld [vmem:[#allocation2 + $0x18] sm:$0xff]  }
  0x53   :  { %v1111_v31 = vpack.c.bf16 %v318_v30, %v317_v29  ;;  %v1410_v33 = vld [vmem:[#allocation2 + $0x20] sm:$0xff]   ;;  %v1414_v34 = vld [vmem:[#allocation2 + $0x28] sm:$0xff]   ;;  %v1416_v35 = vld [vmem:[#allocation2 + $0x30] sm:$0xff]  }
  0x54   :  { %916 = vmatpush3.bf16.msra.mxu0 %v1162_v2  ;;  %v1420_v36 = vld [vmem:[#allocation2 + $0x38] sm:$0xff]   ;;  %v319_v37 = vld [vmem:[#allocation7 + $0x70] sm:$0xff]  ;;  %v489_v40 = vld [vmem:[#allocation8] sm:$0xff] }
  0x55   :  { %917 = vmatprep.subr.bf16.mxu0 %v1163_v3  ;;  %1094 = vmatpush3.bf16.msra.mxu1 %v1091_v12  ;;  %v320_v38 = vld [vmem:[#allocation7 + $0x78] sm:$0xff]  ;;  %v490_v41 = vld [vmem:[#allocation8 + $0x8] sm:$0xff]  ;;  %v491_v42 = vld [vmem:[#allocation8 + $0x10] sm:$0xff] }
  0x56   :  { %1096 = vmatprep.subr.bf16.mxu1 %v1095_v16  ;;  %v1115_v39 = vpack.c.bf16 %v320_v38, %v319_v37  ;;  %v1119_v43 = vpack.c.bf16 %v490_v41, %v489_v40  ;;  %v492_v44 = vld [vmem:[#allocation8 + $0x18] sm:$0xff]  ;;  %v493_v46 = vld [vmem:[#allocation8 + $0x20] sm:$0xff]  ;;  %v494_v47 = vld [vmem:[#allocation8 + $0x28] sm:$0xff] }
  0x57   :  { %v1123_v45 = vpack.c.bf16 %v492_v44, %v491_v42  ;;  %v1127_v48 = vpack.c.bf16 %v494_v47, %v493_v46  ;;  %v495_v49 = vld [vmem:[#allocation8 + $0x30] sm:$0xff]  ;;  %v496_v50 = vld [vmem:[#allocation8 + $0x38] sm:$0xff]  ;;  %v497_v52 = vld [vmem:[#allocation8 + $0x40] sm:$0xff] }
  0x58   :  { %918 = vmatpush3.bf16.msra.mxu0 %v1163_v3  ;;  %v1131_v51 = vpack.c.bf16 %v496_v50, %v495_v49  ;;  %v498_v53 = vld [vmem:[#allocation8 + $0x48] sm:$0xff]  ;;  %v499_v55 = vld [vmem:[#allocation8 + $0x50] sm:$0xff]  ;;  %v500_v56 = vld [vmem:[#allocation8 + $0x58] sm:$0xff] }
  0x59   :  { %919 = vmatprep.subr.bf16.mxu0 %v1164_v5  ;;  %1098 = vmatpush3.bf16.msra.mxu1 %v1095_v16  ;;  %v1135_v54 = vpack.c.bf16 %v498_v53, %v497_v52  ;;  %v1139_v57 = vpack.c.bf16 %v500_v56, %v499_v55  ;;  %v501_v58 = vld [vmem:[#allocation8 + $0x60] sm:$0xff]  ;;  %v502_v59 = vld [vmem:[#allocation8 + $0x68] sm:$0xff]  ;;  %v503_v14 = vld [vmem:[#allocation8 + $0x70] sm:$0xff] }
  0x5a   :  { %1100 = vmatprep.subr.bf16.mxu1 %v1099_v20  ;;  %v1143_v60 = vpack.c.bf16 %v502_v59, %v501_v58  ;;  %v813_v17 = vld [vmem:[%s1455_s3] ss:$0 sm:$0xff] }
  0x5c   :  { %920 = vmatpush3.bf16.msra.mxu0 %v1164_v5 }
  0x5d   :  { %921 = vmatprep.subr.bf16.mxu0 %v1165_v6  ;;  %1102 = vmatpush3.bf16.msra.mxu1 %v1099_v20 }
  0x5e   :  { %1104 = vmatprep.subr.bf16.mxu1 %v1103_v23 }
  0x60   :  { %922 = vmatpush3.bf16.msra.mxu0 %v1165_v6 }
  0x61   :  { %923 = vmatprep.subr.bf16.mxu0 %v1166_v15  ;;  %1106 = vmatpush3.bf16.msra.mxu1 %v1103_v23 }
  0x62   :  { %1108 = vmatprep.subr.bf16.mxu1 %v1107_v28 }
  0x64   :  { %924 = vmatpush3.bf16.msra.mxu0 %v1166_v15  ;;  %v504_v15 = vld [vmem:[#allocation8 + $0x78] sm:$0xff] }
  0x65   :  { %925 = vmatprep.subr.bf16.mxu0 %v1167_v19  ;;  %1110 = vmatpush3.bf16.msra.mxu1 %v1107_v28  ;;  %v1147_v16 = vpack.c.bf16 %v504_v15, %v503_v14 }
  0x66   :  { %1112 = vmatprep.subr.bf16.mxu1 %v1111_v31 }
  0x68   :  { %926 = vmatpush3.bf16.msra.mxu0 %v1167_v19 }
  0x69   :  { %1114 = vmatpush3.bf16.msra.mxu1 %v1111_v31  ;;  %1120 = vmatprep.subr.bf16.mxu0 %v1119_v43 }
  0x6a   :  { %1116 = vmatprep.subr.bf16.mxu1 %v1115_v39 }
  0x6b   :  { %928 = vmatmul.mubr.bf16.vlgmr.msra.gmra.mrb[0].mxu0 %v1402_v24 }
  0x6c   :  { %931 = vmatprep.mubr.bf16.mxu0 %v1404_v27  ;;  %1122 = vmatpush3.bf16.msra.mxu0 %v1119_v43 }
  0x6d   :  { %1118 = vmatpush3.bf16.msra.mxu1 %v1115_v39  ;;  %1124 = vmatprep.subr.bf16.mxu0 %v1123_v45 }
  0x70   :  { %1126 = vmatpush3.bf16.msra.mxu0 %v1123_v45 }
  0x71   :  { %1128 = vmatprep.subr.bf16.mxu0 %v1127_v48 }
  0x73   :  { %932 = vmatmul.mubr.bf16.gmra.mrb[4].mxu0 %v1408_v32 }
  0x74   :  { %935 = vmatprep.mubr.bf16.mxu0 %v1410_v33  ;;  %1130 = vmatpush3.bf16.msra.mxu0 %v1127_v48 }
  0x75   :  { %1132 = vmatprep.subr.bf16.mxu0 %v1131_v51 }
  0x78   :  { %1134 = vmatpush3.bf16.msra.mxu0 %v1131_v51 }
  0x79   :  { %1136 = vmatprep.subr.bf16.mxu0 %v1135_v54 }
  0x7b   :  { %936 = vmatmul.mubr.bf16.gmra.mrb[8].mxu0 %v1414_v34 }
  0x7c   :  { %939 = vmatprep.mubr.bf16.mxu0 %v1416_v35  ;;  %1138 = vmatpush3.bf16.msra.mxu0 %v1135_v54 }
  0x7d   :  { %1140 = vmatprep.subr.bf16.mxu0 %v1139_v57 }
  0x80   :  { %1142 = vmatpush3.bf16.msra.mxu0 %v1139_v57 }
  0x81   :  { %1144 = vmatprep.subr.bf16.mxu0 %v1143_v60 }
  0x83   :  { %940 = vmatmul.mubr.bf16.gmra.mrb[12].mxu0 %v1420_v36 }
  0x84   :  { %1146 = vmatpush3.bf16.msra.mxu0 %v1143_v60 }
  0x85   :  { %1148 = vmatprep.subr.bf16.mxu0 %v1147_v16 }
  0x88   :  { %1150 = vmatpush3.bf16.msra.mxu0 %v1147_v16 }
 0x13e   :  { %v929_v61 = vpop.f32.mrb[0].mxu0 }
 0x13f   :  { %v242_v62 = vpop.f32.mrb[1].mxu0 }
 0x140   :  { %v930_v63 = vpop.f32.mrb[2].mxu0  ;;  %975 = vmatprep.mubr.f32.mxu1 %v242_v62 }
 0x141   :  { %v245_v0 = vpop.f32.mrb[3].mxu0 }
 0x142   :  { %976 = vmatmul.mubr.f32.vlgmr.msra.gmra.mrb[0].mxu1 %v245_v0 }
 0x143   :  { %978 = vmatprep.mubr.f32.mxu1 %v929_v61 }
 0x146   :  { %v933_v1 = vpop.f32.mrb[4].mxu0  ;;  %979 = vmatmul.mubr.f32.gmra.mrb[2].mxu1 %v930_v63 }
 0x147   :  { %v258_v2 = vpop.f32.mrb[5].mxu0 }
 0x148   :  { %v934_v3 = vpop.f32.mrb[6].mxu0  ;;  %981 = vmatprep.mubr.f32.mxu1 %v258_v2 }
 0x149   :  { %v261_v5 = vpop.f32.mrb[7].mxu0 }
 0x14a   :  { %982 = vmatmul.mubr.f32.gmra.mrb[4].mxu1 %v261_v5 }
 0x14b   :  { %984 = vmatprep.mubr.f32.mxu1 %v933_v1 }
 0x14e   :  { %v937_v6 = vpop.f32.mrb[8].mxu0  ;;  %985 = vmatmul.mubr.f32.gmra.mrb[6].mxu1 %v934_v3 }
 0x14f   :  { %v274_v7 = vpop.f32.mrb[9].mxu0 }
 0x150   :  { %v938_v8 = vpop.f32.mrb[10].mxu0  ;;  %987 = vmatprep.mubr.f32.mxu1 %v274_v7 }
 0x151   :  { %v277_v9 = vpop.f32.mrb[11].mxu0 }
 0x152   :  { %988 = vmatmul.mubr.f32.gmra.mrb[8].mxu1 %v277_v9 }
 0x153   :  { %990 = vmatprep.mubr.f32.mxu1 %v937_v6 }
 0x156   :  { %v941_v10 = vpop.f32.mrb[12].mxu0  ;;  %991 = vmatmul.mubr.f32.gmra.mrb[10].mxu1 %v938_v8 }
 0x157   :  { %v290_v11 = vpop.f32.mrb[13].mxu0 }
 0x158   :  { %v942_v12 = vpop.f32.mrb[14].mxu0  ;;  %993 = vmatprep.mubr.f32.mxu1 %v290_v11 }
 0x159   :  { %v293_v13 = vpop.f32.mrb[15].mxu0 }
 0x15a   :  { %994 = vmatmul.mubr.f32.gmra.mrb[12].mxu1 %v293_v13 }
 0x15b   :  { %996 = vmatprep.mubr.f32.mxu1 %v941_v10 }
 0x15e   :  { %997 = vmatmul.mubr.f32.gmra.mrb[14].mxu1 %v942_v12 }
 0x15f   :  { %1071 = vmatprep.mubr.bf16.mxu1 %v1399_v4 }
 0x215   :  { %v977_v18 = vpop.f32.mrb[0].mxu1 }
 0x216   :  { %v400_v19 = vadd.f32 %v977_v18, %v813_v17  ;;  %v394_v20 = vpop.f32.mrb[1].mxu1 }
 0x217   :  { %v395_v21 = vadd.f32 %v813_v17, %v394_v20 }
 0x218   :  { %v474_v25 = vmax.f32 %v400_v19, 0.0 }
 0x219   :  { %v473_v22 = vmax.f32 %v395_v21, 0.0  ;;  %v980_v23 = vpop.f32.mrb[2].mxu1 }
 0x21a   :  { %v410_v26 = vadd.f32 %v980_v23, %v813_v17  ;;  %v404_v28 = vpop.f32.mrb[3].mxu1 }
 0x21b   :  { %v405_v29 = vadd.f32 %v813_v17, %v404_v28  ;;  %1031 = vmatprep.mubr.f32.mxu0 %v473_v22 }
 0x21c   :  { %1032 = vmatmul.mubr.f32.vlgmr.msra.gmra.mrb[16].mxu0 %v474_v25  ;;  %v476_v31 = vmax.f32 %v410_v26, 0.0 }
 0x21d   :  { %v475_v4 = vmax.f32 %v405_v29, 0.0  ;;  %v983_v30 = vpop.f32.mrb[4].mxu1 }
 0x21e   :  { %v420_v37 = vadd.f32 %v983_v30, %v813_v17  ;;  %v414_v38 = vpop.f32.mrb[5].mxu1 }
 0x21f   :  { %v415_v39 = vadd.f32 %v813_v17, %v414_v38  ;;  %1034 = vmatprep.mubr.f32.mxu0 %v475_v4 }
 0x220   :  { %1035 = vmatmul.mubr.f32.gmra.mrb[18].mxu0 %v476_v31  ;;  %v478_v42 = vmax.f32 %v420_v37, 0.0 }
 0x221   :  { %v477_v40 = vmax.f32 %v415_v39, 0.0  ;;  %v986_v41 = vpop.f32.mrb[6].mxu1  ;;  %v814_v39 = vld [vmem:[%s1457_s5] ss:$0 sm:$0xff]  ;;  %s1302_s5 = smov [#allocation10]  }
 0x222   :  { %v430_v43 = vadd.f32 %v986_v41, %v813_v17  ;;  %v424_v44 = vpop.f32.mrb[7].mxu1  ;;  %s783_s23 = sshll.u32 %s1302_s5, 4  ;;  %s784_s23 = int_to_ptr.vmem [resolvable:$true] %s783_s23 }
 0x223   :  { %v425_v45 = vadd.f32 %v813_v17, %v424_v44  ;;  %1037 = vmatprep.mubr.f32.mxu0 %v477_v40  ;;  %s1264_s25 = scalar_lea.vmem %s784_s23, 2048  ;;  %p1269_p5 = scmp.lt.s32.totalorder %s784_s23, %s784_s23 }
 0x224   :  { %1038 = vmatmul.mubr.f32.gmra.mrb[20].mxu0 %v478_v42  ;;  %v480_v48 = vmax.f32 %v430_v43, 0.0  ;;  %p1265_p4 = scmp.ne.s32.totalorder %s784_s23, %s1264_s25  ;;  %p1270_p6 = scmp.lt.s32.totalorder %s1264_s25, %s1264_s25 }
 0x225   :  { %v479_v46 = vmax.f32 %v425_v45, 0.0  ;;  %v989_v47 = vpop.f32.mrb[8].mxu1 }
 0x226   :  { %v440_v49 = vadd.f32 %v989_v47, %v813_v17  ;;  %v434_v50 = vpop.f32.mrb[9].mxu1  ;;  %p1271_p7 = por %p1270_p6, %p1269_p5 }
 0x227   :  { %v435_v51 = vadd.f32 %v813_v17, %v434_v50  ;;  %1040 = vmatprep.mubr.f32.mxu0 %v479_v46 }
 0x228   :  { %1041 = vmatmul.mubr.f32.gmra.mrb[22].mxu0 %v480_v48  ;;  %v482_v54 = vmax.f32 %v440_v49, 0.0  ;;  %p1272_p8 = pnand %p1271_p7, %p1265_p4 }
 0x229   :  { %v481_v52 = vmax.f32 %v435_v51, 0.0  ;;  %v992_v53 = vpop.f32.mrb[10].mxu1 }
 0x22a   :  { %v450_v55 = vadd.f32 %v992_v53, %v813_v17  ;;  %v444_v56 = vpop.f32.mrb[11].mxu1 }
 0x22b   :  { %v445_v57 = vadd.f32 %v813_v17, %v444_v56  ;;  %1043 = vmatprep.mubr.f32.mxu0 %v481_v52 }
 0x22c   :  { %1044 = vmatmul.mubr.f32.gmra.mrb[24].mxu0 %v482_v54  ;;  %v484_v60 = vmax.f32 %v450_v55, 0.0 }
 0x22d   :  { %v483_v58 = vmax.f32 %v445_v57, 0.0  ;;  %v995_v59 = vpop.f32.mrb[12].mxu1 }
 0x22e   :  { %v460_v61 = vadd.f32 %v995_v59, %v813_v17  ;;  %v454_v62 = vpop.f32.mrb[13].mxu1 }
 0x22f   :  { %v455_v63 = vadd.f32 %v813_v17, %v454_v62  ;;  %1046 = vmatprep.mubr.f32.mxu0 %v483_v58 }
 0x230   :  { %1047 = vmatmul.mubr.f32.gmra.mrb[26].mxu0 %v484_v60  ;;  %v486_v2 = vmax.f32 %v460_v61, 0.0 }
 0x231   :  { %v485_v0 = vmax.f32 %v455_v63, 0.0  ;;  %v998_v1 = vpop.f32.mrb[14].mxu1 }
 0x232   :  { %v470_v3 = vadd.f32 %v998_v1, %v813_v17  ;;  %v464_v5 = vpop.f32.mrb[15].mxu1 }
 0x233   :  { %v465_v6 = vadd.f32 %v813_v17, %v464_v5  ;;  %1049 = vmatprep.mubr.f32.mxu0 %v485_v0 }
 0x234   :  { %1050 = vmatmul.mubr.f32.gmra.mrb[28].mxu0 %v486_v2  ;;  %v488_v8 = vmax.f32 %v470_v3, 0.0 }
 0x235   :  { %v487_v7 = vmax.f32 %v465_v6, 0.0 }
 0x237   :  { %1052 = vmatprep.mubr.f32.mxu0 %v487_v7 }
 0x238   :  { %1053 = vmatmul.mubr.f32.gmra.mrb[30].mxu0 %v488_v8 }
 0x2ef   :  { %v1033_v9 = vpop.f32.mrb[16].mxu0 }
 0x2f0   :  { %v571_v10 = vpop.f32.mrb[17].mxu0 }
 0x2f1   :  { %v650_v11 = vpack.c.bf16 %v1033_v9, %v571_v10 }
 0x2f3   :  { %v1036_v12 = vpop.f32.mrb[18].mxu0  ;;  %1055 = vmatprep.subr.bf16.mxu1 %v650_v11 }
 0x2f4   :  { %v581_v13 = vpop.f32.mrb[19].mxu0  ;;  %1056 = vmatpush3.bf16.msra.mxu1 %v650_v11 }
 0x2f5   :  { %v651_v14 = vpack.c.bf16 %v1036_v12, %v581_v13 }
 0x2f7   :  { %v1039_v15 = vpop.f32.mrb[20].mxu0  ;;  %1057 = vmatprep.subr.bf16.mxu1 %v651_v14 }
 0x2f8   :  { %v591_v16 = vpop.f32.mrb[21].mxu0  ;;  %1058 = vmatpush3.bf16.msra.mxu1 %v651_v14 }
 0x2f9   :  { %v652_v18 = vpack.c.bf16 %v1039_v15, %v591_v16 }
 0x2fb   :  { %v1042_v17 = vpop.f32.mrb[22].mxu0  ;;  %1059 = vmatprep.subr.bf16.mxu1 %v652_v18 }
 0x2fc   :  { %v601_v19 = vpop.f32.mrb[23].mxu0  ;;  %1060 = vmatpush3.bf16.msra.mxu1 %v652_v18 }
 0x2fd   :  { %v653_v20 = vpack.c.bf16 %v1042_v17, %v601_v19 }
 0x2ff   :  { %v1045_v21 = vpop.f32.mrb[24].mxu0  ;;  %1061 = vmatprep.subr.bf16.mxu1 %v653_v20 }
 0x300   :  { %v611_v22 = vpop.f32.mrb[25].mxu0  ;;  %1062 = vmatpush3.bf16.msra.mxu1 %v653_v20 }
 0x301   :  { %v654_v23 = vpack.c.bf16 %v1045_v21, %v611_v22 }
 0x303   :  { %v1048_v25 = vpop.f32.mrb[26].mxu0  ;;  %1063 = vmatprep.subr.bf16.mxu1 %v654_v23 }
 0x304   :  { %v621_v26 = vpop.f32.mrb[27].mxu0  ;;  %1064 = vmatpush3.bf16.msra.mxu1 %v654_v23 }
 0x305   :  { %v655_v28 = vpack.c.bf16 %v1048_v25, %v621_v26 }
 0x307   :  { %v1051_v29 = vpop.f32.mrb[28].mxu0  ;;  %1065 = vmatprep.subr.bf16.mxu1 %v655_v28 }
 0x308   :  { %v631_v4 = vpop.f32.mrb[29].mxu0  ;;  %1066 = vmatpush3.bf16.msra.mxu1 %v655_v28 }
 0x309   :  { %v656_v30 = vpack.c.bf16 %v1051_v29, %v631_v4 }
 0x30b   :  { %v1054_v31 = vpop.f32.mrb[30].mxu0  ;;  %1067 = vmatprep.subr.bf16.mxu1 %v656_v30 }
 0x30c   :  { %v641_v37 = vpop.f32.mrb[31].mxu0  ;;  %1068 = vmatpush3.bf16.msra.mxu1 %v656_v30 }
 0x30d   :  { %v657_v38 = vpack.c.bf16 %v1054_v31, %v641_v37 }
 0x30f   :  { %1069 = vmatprep.subr.bf16.mxu1 %v657_v38 }
 0x310   :  { %1070 = vmatpush3.bf16.msra.mxu1 %v657_v38 }
 0x313   :  { %1072 = vmatmul.mubr.bf16.vlgmr.msra.gmra.mrb[16].mxu1 %v1402_v24 }
 0x314   :  { %1075 = vmatprep.mubr.bf16.mxu1 %v1404_v27 }
 0x31b   :  { %1076 = vmatmul.mubr.bf16.gmra.mrb[20].mxu1 %v1408_v32 }
 0x31c   :  { %1079 = vmatprep.mubr.bf16.mxu1 %v1410_v33 }
 0x323   :  { %1080 = vmatmul.mubr.bf16.gmra.mrb[24].mxu1 %v1414_v34 }
 0x324   :  { %1083 = vmatprep.mubr.bf16.mxu1 %v1416_v35 }
 0x32b   :  { %1084 = vmatmul.mubr.bf16.gmra.mrb[28].mxu1 %v1420_v36 }
 0x3e6   :  { %v1073_v40 = vpop.f32.mrb[16].mxu1 }
 0x3e7   :  { %v708_v41 = vadd.f32 %v1073_v40, %v814_v39  ;;  %v699_v42 = vpop.f32.mrb[17].mxu1 }
 0x3e8   :  { %v700_v24 = vadd.f32 %v814_v39, %v699_v42  ;;  %v1074_v43 = vpop.f32.mrb[18].mxu1 }
 0x3e9   :  { %764 = vst [vmem:[#allocation10 + $0x10] sm:$0xff] %v708_v41  ;;  %v711_v27 = vadd.f32 %v1074_v43, %v814_v39  ;;  %v702_v32 = vpop.f32.mrb[19].mxu1 }
 0x3ea   :  { %762 = vst [vmem:[#allocation10] sm:$0xff] %v700_v24  ;;  %v703_v33 = vadd.f32 %v814_v39, %v702_v32 }
 0x3eb   :  { %765 = vst [vmem:[#allocation10 + $0x18] sm:$0xff] %v711_v27 }
 0x3ec   :  { %763 = vst [vmem:[#allocation10 + $0x8] sm:$0xff] %v703_v33 }
 0x3ee   :  { %v1077_v34 = vpop.f32.mrb[20].mxu1 }
 0x3ef   :  { %v724_v35 = vadd.f32 %v1077_v34, %v814_v39  ;;  %v715_v44 = vpop.f32.mrb[21].mxu1 }
 0x3f0   :  { %v716_v36 = vadd.f32 %v814_v39, %v715_v44  ;;  %v1078_v45 = vpop.f32.mrb[22].mxu1 }
 0x3f1   :  { %768 = vst [vmem:[#allocation10 + $0x30] sm:$0xff] %v724_v35  ;;  %v727_v46 = vadd.f32 %v1078_v45, %v814_v39  ;;  %v718_v47 = vpop.f32.mrb[23].mxu1 }
 0x3f2   :  { %766 = vst [vmem:[#allocation10 + $0x20] sm:$0xff] %v716_v36  ;;  %v719_v48 = vadd.f32 %v814_v39, %v718_v47 }
 0x3f3   :  { %769 = vst [vmem:[#allocation10 + $0x38] sm:$0xff] %v727_v46 }
 0x3f4   :  { %767 = vst [vmem:[#allocation10 + $0x28] sm:$0xff] %v719_v48 }
 0x3f6   :  { %v1081_v49 = vpop.f32.mrb[24].mxu1 }
 0x3f7   :  { %v740_v50 = vadd.f32 %v1081_v49, %v814_v39  ;;  %v731_v51 = vpop.f32.mrb[25].mxu1 }
 0x3f8   :  { %v732_v52 = vadd.f32 %v814_v39, %v731_v51  ;;  %v1082_v53 = vpop.f32.mrb[26].mxu1 }
 0x3f9   :  { %772 = vst [vmem:[#allocation10 + $0x50] sm:$0xff] %v740_v50  ;;  %v743_v54 = vadd.f32 %v1082_v53, %v814_v39  ;;  %v734_v55 = vpop.f32.mrb[27].mxu1 }
 0x3fa   :  { %770 = vst [vmem:[#allocation10 + $0x40] sm:$0xff] %v732_v52  ;;  %v735_v56 = vadd.f32 %v814_v39, %v734_v55 }
 0x3fb   :  { %773 = vst [vmem:[#allocation10 + $0x58] sm:$0xff] %v743_v54 }
 0x3fc   :  { %771 = vst [vmem:[#allocation10 + $0x48] sm:$0xff] %v735_v56 }
 0x3fe   :  { %v1085_v57 = vpop.f32.mrb[28].mxu1 }
 0x3ff   :  { %v756_v58 = vadd.f32 %v1085_v57, %v814_v39  ;;  %v747_v59 = vpop.f32.mrb[29].mxu1 }
 0x400   :  { %v748_v60 = vadd.f32 %v814_v39, %v747_v59  ;;  %v1086_v61 = vpop.f32.mrb[30].mxu1 }
 0x401   :  { %776 = vst [vmem:[#allocation10 + $0x70] sm:$0xff] %v756_v58  ;;  %v759_v62 = vadd.f32 %v1086_v61, %v814_v39  ;;  %v750_v63 = vpop.f32.mrb[31].mxu1 }
 0x402   :  { %774 = vst [vmem:[#allocation10 + $0x60] sm:$0xff] %v748_v60  ;;  %v751_v0 = vadd.f32 %v814_v39, %v750_v63 }
 0x403   :  { %777 = vst [vmem:[#allocation10 + $0x78] sm:$0xff] %v759_v62 }
 0x404   :  { %775 = vst [vmem:[#allocation10 + $0x68] sm:$0xff] %v751_v0 }
 0x405   :  { %1275 = shalt.err (!%p1272_p8)
}
 0x406   :  { %s1276_s28 = scalar_lea.hbm %s1458_s6, 2048 }
 0x407   :  { %p1277_p9 = scmp.ne.s32.totalorder %s1458_s6, %s1276_s28  ;;  %p1280_p10 = scmp.lt.u32.totalorder %s1276_s28, %s1458_s6 }
 0x409   :  { %p1282_p11 = pnand %p1280_p10, %p1277_p9 }
 0x40b   :  { %1285 = shalt.err (!%p1282_p11)
}
 0x40c   :  { %789 = dma.vmem_to_hbm [thread:$0]  %s784_s23, 2048, %s1458_s6, [#allocation4], %s1299_s0, %s1299_s0, %s1300_s24  }
 0x40d   :  { %1292 = dma.done.wait [#allocation4], 2048  }
 0x40e   :  { %1293 = vsyncadd [#allocation4], 4294965248 }
 0x40f   :  { %793 = vsyncpa [#allocation3], 1 }
 0x410   :  { %794 = vsyncpa [#allocation6], 1 }
 0x411   :  { %795 = vsyncpa [#allocation9], 1 }
 0x412   :  { %796 = vsyncpa [#allocation4], 1 }

</bundles_post_ra>
